<compile_context>
chip_gen: v7x
topology: tpu7x:2x2x1
jax: 0.10.0
libtpu: 0.0.40
codegen_flags: <defaults>
</compile_context>

<pallas_src>
import functools
import math

import jax
import jax.numpy as jnp
from jax.experimental import pallas as pl
from jax.experimental.pallas import tpu as pltpu

_VMEM_LIMIT = 48 * 1024 * 1024  # below v7x 64 MiB physical, above v6e 32 MiB default


def _pick_tile(n, target):
    """Largest divisor of n that is a multiple of 8 and <= target; else full extent."""
    if n <= target:
        return n
    for t in range(target, 7, -1):
        if n % t == 0 and t % 8 == 0:
            return t
    return n


def _erf(z):
    # Abramowitz & Stegun 7.1.26 (max abs err ~1.5e-7): exp + polynomial only, so it
    # lowers on TPU Pallas without relying on an erf primitive.
    a1, a2, a3, a4, a5 = 0.254829592, -0.284496736, 1.421413741, -1.453152027, 1.061405429
    p = 0.3275911
    az = jnp.abs(z)
    t = 1.0 / (1.0 + p * az)
    poly = ((((a5 * t + a4) * t + a3) * t + a2) * t + a1) * t
    y = 1.0 - poly * jnp.exp(-az * az)
    return jnp.where(z >= 0.0, y, -y)


def _gelu_exact(x):
    # x * Phi(x): matches torch.nn.GELU() (erf form) to ~1e-7 absolute.
    return 0.5 * x * (1.0 + _erf(x * (1.0 / math.sqrt(2.0))))


# ---------------------------------------------------------------------------
# Kernel 1: QKV projection (row-tiled matmul, no bias)
# ---------------------------------------------------------------------------
def _qkv_proj_kernel(x_ref, w_ref, o_ref):
    # x_ref: (tr, DIM), w_ref: (DIM, 3*inner), o_ref: (tr, 3*inner)
    o_ref[...] = jnp.dot(
        x_ref[...], w_ref[...], preferred_element_type=jnp.float32
    ).astype(o_ref.dtype)


def qkv_projection(x2d, w_qkv_t):
    rows, dim = x2d.shape
    out_cols = w_qkv_t.shape[1]
    tr = _pick_tile(rows, 256)
    grid = (rows // tr,)
    flops = 2 * rows * dim * out_cols
    bytes_accessed = int(
        (x2d.size + w_qkv_t.size + rows * out_cols) * x2d.dtype.itemsize)
    return pl.pallas_call(
        _qkv_proj_kernel,
        out_shape=jax.ShapeDtypeStruct((rows, out_cols), x2d.dtype),
        grid_spec=pltpu.PrefetchScalarGridSpec(
            num_scalar_prefetch=0,
            grid=grid,
            in_specs=[
                pl.BlockSpec((tr, dim), lambda i: (i, 0)),
                pl.BlockSpec((dim, out_cols), lambda i: (0, 0)),
            ],
            out_specs=pl.BlockSpec((tr, out_cols), lambda i: (i, 0)),
        ),
        compiler_params=pltpu.CompilerParams(
            dimension_semantics=("parallel",),
            vmem_limit_bytes=_VMEM_LIMIT,
        ),
        cost_estimate=pl.CostEstimate(
            flops=int(flops), transcendentals=0, bytes_accessed=bytes_accessed),
    )(x2d, w_qkv_t)


# ---------------------------------------------------------------------------
# Kernel 2: head-batched flash attention (online softmax over kv tiles)
# ---------------------------------------------------------------------------
def _flash_attn_kernel(q_ref, k_ref, v_ref, o_ref, m_sc, l_sc, acc_sc, *, scale):
    # q_ref: (1, H, tq, d)   k_ref/v_ref: (1, H, tk, d)   o_ref: (1, H, tq, d)
    ki = pl.program_id(2)

    @pl.when(ki == 0)
    def _init():
        m_sc[...] = jnp.full(m_sc.shape, -jnp.inf, dtype=m_sc.dtype)
        l_sc[...] = jnp.zeros(l_sc.shape, dtype=l_sc.dtype)
        acc_sc[...] = jnp.zeros(acc_sc.shape, dtype=acc_sc.dtype)

    q = q_ref[0]  # (H, tq, d) -- native dtype straight into the MXU
    k = k_ref[0]  # (H, tk, d)
    v = v_ref[0]  # (H, tk, d)

    # Head-batched Q @ K^T with f32 accumulation.
    s = jax.lax.dot_general(
        q, k,
        dimension_numbers=(((2,), (2,)), ((0,), (0,))),
        preferred_element_type=jnp.float32,
    ) * scale                                              # (H, tq, tk) f32

    m_prev = m_sc[...]                                     # (H, tq, 1) f32
    m_new = jnp.maximum(m_prev, jnp.max(s, axis=-1, keepdims=True))
    alpha = jnp.exp(m_prev - m_new)                        # rescale of old stats
    p = jnp.exp(s - m_new)                                 # (H, tq, tk) f32
    l_sc[...] = alpha * l_sc[...] + jnp.sum(p, axis=-1, keepdims=True)

    pv = jax.lax.dot_general(
        p.astype(v.dtype), v,
        dimension_numbers=(((2,), (1,)), ((0,), (0,))),
        preferred_element_type=jnp.float32,
    )                                                      # (H, tq, d) f32
    acc_sc[...] = alpha * acc_sc[...] + pv
    m_sc[...] = m_new

    @pl.when(ki == pl.num_programs(2) - 1)
    def _finalize():
        inv = pl.reciprocal(l_sc[...], approx=True)        # EUP slot, not VPU divide
        o_ref[0] = (acc_sc[...] * inv).astype(o_ref.dtype)


def flash_attention(q, k, v, *, scale, tq_target=256, tk_target=512):
    B, H, N, d = q.shape
    tq = _pick_tile(N, tq_target)
    tk = _pick_tile(N, tk_target)
    grid = (B, N // tq, N // tk)
    kernel = functools.partial(_flash_attn_kernel, scale=scale)
    flops = 4 * B * H * N * N * d
    bytes_accessed = int(4 * B * H * N * d * q.dtype.itemsize)
    return pl.pallas_call(
        kernel,
        out_shape=jax.ShapeDtypeStruct((B, H, N, d), q.dtype),
        grid_spec=pltpu.PrefetchScalarGridSpec(
            num_scalar_prefetch=0,
            grid=grid,
            in_specs=[
                pl.BlockSpec((1, H, tq, d), lambda b, qi, ki: (b, 0, qi, 0)),
                pl.BlockSpec((1, H, tk, d), lambda b, qi, ki: (b, 0, ki, 0)),
                pl.BlockSpec((1, H, tk, d), lambda b, qi, ki: (b, 0, ki, 0)),
            ],
            out_specs=pl.BlockSpec((1, H, tq, d), lambda b, qi, ki: (b, 0, qi, 0)),
            scratch_shapes=[
                pltpu.VMEM((H, tq, 1), jnp.float32),   # running max m
                pltpu.VMEM((H, tq, 1), jnp.float32),   # running sum l
                pltpu.VMEM((H, tq, d), jnp.float32),   # un-normalized accumulator
            ],
        ),
        compiler_params=pltpu.CompilerParams(
            dimension_semantics=("parallel", "parallel", "arbitrary"),
            vmem_limit_bytes=_VMEM_LIMIT,
        ),
        cost_estimate=pl.CostEstimate(
            flops=int(flops), transcendentals=int(B * H * N * N),
            bytes_accessed=bytes_accessed),
    )(q, k, v)


# ---------------------------------------------------------------------------
# Kernel 3: output projection fused with bias add + exact GELU
# ---------------------------------------------------------------------------
def _out_proj_kernel(x_ref, w_ref, b_ref, o_ref):
    # x_ref: (tr, inner), w_ref: (inner, DIM), b_ref: (1, DIM), o_ref: (tr, DIM)
    acc = jnp.dot(x_ref[...], w_ref[...], preferred_element_type=jnp.float32)
    acc = acc + b_ref[...].astype(jnp.float32)
    acc = _gelu_exact(acc)                  # exact (erf) GELU in f32
    o_ref[...] = acc.astype(o_ref.dtype)    # Dropout(0.0) is identity


def out_projection(x2d, w_out_t, b_out):
    rows, inner = x2d.shape
    dim = w_out_t.shape[1]
    tr = _pick_tile(rows, 256)
    grid = (rows // tr,)
    b2d = b_out.reshape(1, dim)
    flops = 2 * rows * inner * dim
    bytes_accessed = int(
        (x2d.size + w_out_t.size + dim + rows * dim) * x2d.dtype.itemsize)
    return pl.pallas_call(
        _out_proj_kernel,
        out_shape=jax.ShapeDtypeStruct((rows, dim), x2d.dtype),
        grid_spec=pltpu.PrefetchScalarGridSpec(
            num_scalar_prefetch=0,
            grid=grid,
            in_specs=[
                pl.BlockSpec((tr, inner), lambda i: (i, 0)),
                pl.BlockSpec((inner, dim), lambda i: (0, 0)),
                pl.BlockSpec((1, dim), lambda i: (0, 0)),
            ],
            out_specs=pl.BlockSpec((tr, dim), lambda i: (i, 0)),
        ),
        compiler_params=pltpu.CompilerParams(
            dimension_semantics=("parallel",),
            vmem_limit_bytes=_VMEM_LIMIT,
        ),
        cost_estimate=pl.CostEstimate(
            flops=int(flops), transcendentals=int(rows * dim),
            bytes_accessed=bytes_accessed),
    )(x2d, w_out_t, b2d)


# ---------------------------------------------------------------------------
# Full forward (matches p4transformer.Attention.forward)
# ---------------------------------------------------------------------------
def attention_forward(x, w_qkv_t, w_out_t, b_out, *, heads, dim_head):
    """x: (B, N, DIM); w_qkv_t: (DIM, 3*inner); w_out_t: (inner, DIM); b_out: (DIM,)."""
    B, N, DIM = x.shape
    inner = heads * dim_head
    scale = float(dim_head) ** -0.5
    project_out = not (heads == 1 and dim_head == DIM)

    qkv = qkv_projection(x.reshape(B * N, DIM), w_qkv_t)        # (B*N, 3*inner)
    qkv = qkv.reshape(B, N, 3, heads, dim_head)
    q = jnp.transpose(qkv[:, :, 0], (0, 2, 1, 3))               # (B, H, N, d)
    k = jnp.transpose(qkv[:, :, 1], (0, 2, 1, 3))
    v = jnp.transpose(qkv[:, :, 2], (0, 2, 1, 3))

    o = flash_attention(q, k, v, scale=scale)                   # (B, H, N, d)
    o2d = jnp.transpose(o, (0, 2, 1, 3)).reshape(B * N, inner)  # 'b h n d -> b n (h d)'

    if project_out:
        out = out_projection(o2d, w_out_t, b_out)               # (B*N, DIM)
        return out.reshape(B, N, DIM)
    return o2d.reshape(B, N, inner)                             # nn.Identity path


def attention_reference(x, w_qkv_t, w_out_t, b_out, *, heads, dim_head):
    """Pure-JAX reference mirroring the PyTorch module."""
    B, N, DIM = x.shape
    inner = heads * dim_head
    scale = float(dim_head) ** -0.5
    project_out = not (heads == 1 and dim_head == DIM)
    qkv = x @ w_qkv_t
    q, k, v = jnp.split(qkv, 3, axis=-1)

    def split_heads(t):
        return t.reshape(B, N, heads, dim_head).transpose(0, 2, 1, 3)

    q, k, v = map(split_heads, (q, k, v))
    dots = jnp.einsum("bhid,bhjd->bhij", q, k) * scale
    attn = jax.nn.softmax(dots, axis=-1)
    out = jnp.einsum("bhij,bhjd->bhid", attn, v)
    out = out.transpose(0, 2, 1, 3).reshape(B, N, inner)
    if project_out:
        out = out @ w_out_t + b_out
        out = jax.nn.gelu(out, approximate=False)
    return out


if __name__ == "__main__":
    # Small shapes consistent with the module's forward: x is (B, N, DIM).
    B, N, DIM = 2, 8, 32
    heads, dim_head = 4, 16          # project_out == True
    inner = heads * dim_head

    key = jax.random.PRNGKey(0)
    kx, kq, ko, kb = jax.random.split(key, 4)

    x = jax.random.normal(kx, (B, N, DIM), dtype=jnp.float32)

    # PyTorch-Linear-style init, stored pre-transposed as (in_features, out_features).
    bound_qkv = 1.0 / (DIM ** 0.5)
    w_qkv_t = jax.random.uniform(kq, (DIM, 3 * inner), jnp.float32,
                                 minval=-bound_qkv, maxval=bound_qkv)
    bound_out = 1.0 / (inner ** 0.5)
    w_out_t = jax.random.uniform(ko, (inner, DIM), jnp.float32,
                                 minval=-bound_out, maxval=bound_out)
    b_out = jax.random.uniform(kb, (DIM,), jnp.float32,
                               minval=-bound_out, maxval=bound_out)

    out = attention_forward(x, w_qkv_t, w_out_t, b_out, heads=heads, dim_head=dim_head)
    out = jax.block_until_ready(out)

    ref = attention_reference(x, w_qkv_t, w_out_t, b_out, heads=heads, dim_head=dim_head)
    assert out.shape == (B, N, DIM)
    # Tolerance covers the approx (EUP) reciprocal in the softmax finalize and the
    # ~1.5e-7 polynomial erf used for the exact GELU inside the kernel.
    assert jnp.allclose(out, ref, atol=5e-3, rtol=5e-3), "mismatch vs reference"

    print("KERNEL_OK")
</pallas_src>

<mosaic_0001>
module attributes {stable_mosaic.version = 11 : i64} {
  func.func @_qkv_proj_kernel(%arg0: i32, %arg1: memref<16x32xf32, #tpu.memory_space<vmem>>, %arg2: memref<32x192xf32, #tpu.memory_space<vmem>>, %arg3: memref<16x192xf32, #tpu.memory_space<vmem>>) attributes {dimension_semantics = [#tpu.dimension_semantics<parallel>], iteration_bounds = array<i64: 1>, scalar_prefetch = 0 : i64, scratch_operands = 0 : i64, tpu.core_type = #tpu.core_type<tc>, window_params = [{transform_indices = @transform_0, window_bounds = array<i64: 16, 32>}, {pipeline_mode = #tpu.pipeline_mode<synchronous>, transform_indices = @transform_1, window_bounds = array<i64: 32, 192>}, {transform_indices = @transform_2, window_bounds = array<i64: 16, 192>}]} {
    %c0 = arith.constant 0 : index
    %c0_0 = arith.constant 0 : index
    %0 = vector.load %arg1[%c0, %c0_0] : memref<16x32xf32, #tpu.memory_space<vmem>>, vector<16x32xf32>
    %c0_1 = arith.constant 0 : index
    %c0_2 = arith.constant 0 : index
    %1 = vector.load %arg2[%c0_1, %c0_2] : memref<32x192xf32, #tpu.memory_space<vmem>>, vector<32x192xf32>
    %cst = arith.constant dense<0.000000e+00> : vector<16x192xf32>
    %2 = tpu.matmul %0, %1, %cst {dimension_numbers = #tpu.dot_dimension_numbers<[1], [0], [0], [1], [0, 0, 1, 1], [], []>} : vector<16x32xf32>, vector<32x192xf32>, vector<16x192xf32> -> vector<16x192xf32>
    %c0_3 = arith.constant 0 : index
    %c0_4 = arith.constant 0 : index
    %3 = vector.load %arg3[%c0_3, %c0_4] : memref<16x192xf32, #tpu.memory_space<vmem>>, vector<16x192xf32>
    tpu.vector_store %arg3[%c0_3, %c0_4], %2 {strides = array<i32>} : memref<16x192xf32, #tpu.memory_space<vmem>>, vector<16x192xf32>,
    return
  }
  func.func @transform_0(%arg0: i32) -> (i32, i32) {
    %c0_i32 = arith.constant 0 : i32
    %c0_i32_0 = arith.constant 0 : i32
    return %arg0, %c0_i32 : i32, i32
  }
  func.func @transform_1(%arg0: i32) -> (i32, i32) {
    %c0_i32 = arith.constant 0 : i32
    %c0_i32_0 = arith.constant 0 : i32
    %c0_i32_1 = arith.constant 0 : i32
    return %c0_i32, %c0_i32_0 : i32, i32
  }
  func.func @transform_2(%arg0: i32) -> (i32, i32) {
    %c0_i32 = arith.constant 0 : i32
    %c0_i32_0 = arith.constant 0 : i32
    return %arg0, %c0_i32 : i32, i32
  }
}

</mosaic_0001>

<bundles_post_ra>
// kernel: tpu_custom_call.1
= control target key start
LH: loop header
LB: loop body
LE: loop exit
PB: predicated region body
PF: predicated region fallthrough
CT: control target
= control target key end

     0   :  { %7 = vsyncpa [#allocation3], 0  ;;  %s316_s0 = inlined_call_operand.hbm [shape: f32[16,32], index: 0, kind: input, shape index: {}]   ;;  %s317_s1 = inlined_call_operand.hbm [shape: f32[32,192], index: 1, kind: input, shape index: {}]   ;;  %s318_s2 = inlined_call_operand.hbm [shape: f32[16,192], index: 2, kind: output, shape index: {}]  }
   0x1   :  { %8 = vsyncpa [#allocation6], 0 }
   0x2   :  { %9 = vsyncpa [#allocation4], 0  ;;  %s251_s9 = smov [#allocation2]   ;;  %s179_s13 = scalar_lea.hbm %s316_s0, 256 }
   0x3   :  { %s15_s10 = sshll.u32 %s251_s9, 4  ;;  %p180_p0 = scmp.ne.s32.totalorder %s316_s0, %s179_s13  ;;  %s16_s10 = int_to_ptr.vmem [resolvable:$true] %s15_s10 }
   0x4   :  { %p183_p1 = scmp.lt.u32.totalorder %s179_s13, %s316_s0 }
   0x6   :  { %p185_p2 = pnand %p183_p1, %p180_p0 }
   0x8   :  { %188 = shalt.err (!%p185_p2)
}
   0x9   :  { %s189_s18 = scalar_lea.vmem %s16_s10, 256  ;;  %p194_p4 = scmp.lt.s32.totalorder %s16_s10, %s16_s10 }
   0xa   :  { %p190_p3 = scmp.ne.s32.totalorder %s16_s10, %s189_s18  ;;  %p195_p5 = scmp.lt.s32.totalorder %s189_s18, %s189_s18 }
   0xc   :  { %p196_p6 = por %p195_p5, %p194_p4 }
   0xe   :  { %p197_p7 = pnand %p196_p6, %p190_p3 }
  0x10   :  { %200 = shalt.err (!%p197_p7)
}
  0x11   :  { %s252_s19 = smov 128   ;;  %s253_s20 = smov 8  }
  0x12   :  { %21 = dma.hbm_to_vmem [thread:$0]  %s316_s0, 256, %s16_s10, [#allocation3], %s252_s19, %s252_s19, %s253_s20  }
  0x13   :  { %s254_s23 = smov [#allocation5]   ;;  %s201_s27 = scalar_lea.hbm %s317_s1, 1024 }
  0x14   :  { %s27_s24 = sshll.u32 %s254_s23, 4  ;;  %p202_p8 = scmp.ne.s32.totalorder %s317_s1, %s201_s27  ;;  %s28_s24 = int_to_ptr.vmem [resolvable:$true] %s27_s24 }
  0x15   :  { %p205_p9 = scmp.lt.u32.totalorder %s201_s27, %s317_s1 }
  0x17   :  { %p207_p10 = pnand %p205_p9, %p202_p8 }
  0x19   :  { %210 = shalt.err (!%p207_p10)
}
  0x1a   :  { %s211_s4 = scalar_lea.vmem %s28_s24, 1024  ;;  %p216_p12 = scmp.lt.s32.totalorder %s28_s24, %s28_s24 }
  0x1b   :  { %p212_p11 = scmp.ne.s32.totalorder %s28_s24, %s211_s4  ;;  %p217_p13 = scmp.lt.s32.totalorder %s211_s4, %s211_s4 }
  0x1d   :  { %p218_p0 = por %p217_p13, %p216_p12 }
  0x1f   :  { %p219_p1 = pnand %p218_p0, %p212_p11 }
  0x21   :  { %222 = shalt.err (!%p219_p1)
}
  0x22   :  { %s255_s0 = smov 256   ;;  %s256_s5 = smov 16  }
  0x23   :  { %33 = dma.hbm_to_vmem [thread:$0]  %s317_s1, 1024, %s28_s24, [#allocation6], %s255_s0, %s255_s0, %s256_s5  }
  0x24   :  { %245 = dma.done.wait [#allocation3], 256  }
  0x25   :  { %246 = vsyncadd [#allocation3], 4294967040 }
  0x26   :  { %247 = dma.done.wait [#allocation6], 1024  }
  0x27   :  { %248 = vsyncadd [#allocation6], 4294966272  ;;  %v257_v0 = vmov 0.0   ;;  %v43_v1 = vld [vmem:[#allocation5 + $0x8] sm:$0xff]  ;;  %v45_v2 = vld [vmem:[#allocation5 + $0x18] sm:$0xff]  ;;  %vm50_vm0 = vcmask 261120  }
  0x28   :  { %121 = vmatprep.mubr.f32.mxu0 %v257_v0  ;;  %127 = vmatprep.mubr.f32.mxu1 %v257_v0  ;;  %v42_v3 = vld [vmem:[#allocation5] sm:$0xff]  ;;  %v159_v4 = vpack.c.bf16 %v45_v2, %v43_v1  ;;  %v44_v5 = vld [vmem:[#allocation5 + $0x10] sm:$0xff]  ;;  %v47_v6 = vld [vmem:[#allocation5 + $0x28] sm:$0xff]  ;;  %s258_s1 = smov [#allocation7]   ;;  %vm135_vm1 = vcmask 523264  }
  0x29   :  { %v49_v7 = vld [vmem:[#allocation5 + $0x38] sm:$0xff]  ;;  %v161_v8 = vpack.c.bf16 %v44_v5, %v42_v3  ;;  %v46_v10 = vld [vmem:[#allocation5 + $0x20] sm:$0xff]  ;;  %v48_v11 = vld [vmem:[#allocation5 + $0x30] sm:$0xff]  ;;  %s144_s8 = sshll.u32 %s258_s1, 4  ;;  %s145_s8 = int_to_ptr.vmem [resolvable:$true] %s144_s8 }
  0x2a   :  { %v163_v9 = vpack.c.bf16 %v49_v7, %v47_v6  ;;  %160 = vmatprep.subr.bf16.mxu0 %v159_v4  ;;  %167 = vmatprep.subr.bf16.mxu1 %v159_v4  ;;  %v165_v12 = vpack.c.bf16 %v48_v11, %v46_v10  ;;  %v40_v13 = vld [vmem:[#allocation2] sm:$0xff]  ;;  %v41_v14 = vld [vmem:[#allocation2 + $0x8] sm:$0xff]  ;;  %s223_s9 = scalar_lea.vmem %s145_s8, 512  ;;  %p228_p3 = scmp.lt.s32.totalorder %s145_s8, %s145_s8 }
  0x2b   :  { %162 = vmatpush1.bf16.msra.mxu0 %v161_v8  ;;  %169 = vmatpush1.bf16.msra.mxu1 %v161_v8  ;;  %p224_p2 = scmp.ne.s32.totalorder %s145_s8, %s223_s9  ;;  %p229_p4 = scmp.lt.s32.totalorder %s223_s9, %s223_s9 }
  0x2c   :  { %164 = vmatprep.subr.bf16.mxu0 %v163_v9  ;;  %168 = vmatprep.subr.bf16.mxu1 %v163_v9 }
  0x2d   :  { %p230_p5 = por %p229_p4, %p228_p3 }
  0x2f   :  { %166 = vmatpush1.bf16.msra.mxu0 %v165_v12  ;;  %170 = vmatpush1.bf16.msra.mxu1 %v165_v12  ;;  %p231_p6 = pnand %p230_p5, %p224_p2 }
  0x32   :  { %157 = vmatmul.mubr.msk.f32.vlgmr.msra.gmra.mrb[0].mxu0 %vm50_vm0, %v40_v13  ;;  %158 = vmatmul.mubr.msk.f32.vlgmr.msra.gmra.mrb[0].mxu1 %vm50_vm0, %v41_v14 }
 0x105   :  { %v123_v15 = vpop.f32.mrb[0].mxu0  ;;  %v129_v16 = vpop.f32.mrb[0].mxu1 }
 0x106   :  { %134 = vst [vmem:[#allocation7] sm:$0xff] %v123_v15  ;;  %137 = vst [vmem:[#allocation7 + $0x10] sm:$0xff] %v129_v16  ;;  %v125_v17 = vpop.f32.mrb[1].mxu0  ;;  %v131_v18 = vpop.f32.mrb[1].mxu1 }
 0x107   :  { %136 = vst.msk [vmem:[#allocation7 + $0x8] sm:$0xff] %vm135_vm1, %v125_v17  ;;  %138 = vst.msk [vmem:[#allocation7 + $0x18] sm:$0xff] %vm135_vm1, %v131_v18 }
 0x108   :  { %234 = shalt.err (!%p231_p6)
}
 0x109   :  { %s235_s12 = scalar_lea.hbm %s318_s2, 512 }
 0x10a   :  { %p236_p7 = scmp.ne.s32.totalorder %s318_s2, %s235_s12  ;;  %p239_p8 = scmp.lt.u32.totalorder %s235_s12, %s318_s2 }
 0x10c   :  { %p241_p9 = pnand %p239_p8, %p236_p7 }
 0x10e   :  { %244 = shalt.err (!%p241_p9)
}
 0x10f   :  { %150 = dma.vmem_to_hbm [thread:$0]  %s145_s8, 512, %s318_s2, [#allocation4], %s255_s0, %s255_s0, %s256_s5  }
 0x110   :  { %249 = dma.done.wait [#allocation4], 512  }
 0x111   :  { %250 = vsyncadd [#allocation4], 4294966784 }
 0x112   :  { %154 = vsyncpa [#allocation3], 1 }
 0x113   :  { %155 = vsyncpa [#allocation6], 1 }
 0x114   :  { %156 = vsyncpa [#allocation4], 1 }

</bundles_post_ra>
